<compile_context>
chip_gen: v7x
topology: tpu7x:2x2x1
jax: 0.10.0
libtpu: 0.0.40
codegen_flags: <defaults>
</compile_context>

<pallas_src>
import functools

import jax
import jax.numpy as jnp
from jax.experimental import pallas as pl
from jax.experimental.pallas import tpu as pltpu


_SQRT_HALF = 0.7071067811865476


def _round_up(x, m):
    return ((x + m - 1) // m) * m


def _vmem_capacity_bytes():
    try:
        return int(pltpu.get_tpu_info().vmem_capacity_bytes)
    except Exception:
        return 64 << 20  # conservative fallback (v7x per-core VMEM)


def _gelu(h, approximate):
    if approximate:
        # tanh/exp go to the EUP slot, which co-issues with the MXU.
        return jax.nn.gelu(h, approximate=True)
    # Exact erf GELU (torch.nn.GELU() default).
    return 0.5 * h * (1.0 + jax.lax.erf(h * _SQRT_HALF))


# ----------------------------- kernels -------------------------------------


def ffn_kernel_resident(x_ref, w1_ref, b1_ref, w2_ref, b2_ref, o_ref, *,
                        approximate):
    """Whole hidden dim resident in VMEM: single pass, no accumulator."""
    x = x_ref[...]                                              # [tm, dim]
    h = jnp.dot(x, w1_ref[...], preferred_element_type=jnp.float32)
    h = h + b1_ref[...].astype(jnp.float32)                     # [tm, hidden]
    g = _gelu(h, approximate)
    out = jnp.dot(g.astype(x.dtype), w2_ref[...],
                  preferred_element_type=jnp.float32)
    out = out + b2_ref[...].astype(jnp.float32)
    o_ref[...] = out.astype(o_ref.dtype)


def ffn_kernel_streaming(x_ref, w1_ref, b1_ref, w2_ref, b2_ref, o_ref,
                         acc_ref, *, approximate):
    """Hidden dim tiled along grid axis 1; fp32 accumulator in VMEM scratch."""
    k = pl.program_id(1)

    @pl.when(k == 0)
    def _init():
        # Fold the output bias in exactly once at the start of the reduction.
        acc_ref[...] = jnp.broadcast_to(
            b2_ref[...].astype(jnp.float32), acc_ref.shape)

    x = x_ref[...]                                              # [tm, dim]
    h = jnp.dot(x, w1_ref[...], preferred_element_type=jnp.float32)
    h = h + b1_ref[...].astype(jnp.float32)                     # [tm, th]
    g = _gelu(h, approximate)
    acc_ref[...] += jnp.dot(g.astype(x.dtype), w2_ref[...],
                            preferred_element_type=jnp.float32)

    @pl.when(k == pl.num_programs(1) - 1)
    def _store():
        o_ref[...] = acc_ref[...].astype(o_ref.dtype)


# ----------------------------- planning ------------------------------------


def _pick_tm(M, cap):
    """Row tile: divide M when possible, prefer >= 2 row tiles (v7x megacore)."""
    cap = max(8, (cap // 8) * 8)
    for cand in (2048, 1024, 512, 256, 128, 64, 32, 16, 8):
        if cand <= cap and M % cand == 0 and M // cand >= 2:
            return cand, M                       # exact fit, no padding
    if M <= 8 or M > cap:
        tm = min(_round_up(M, 8), cap)
        return tm, _round_up(M, tm)
    # Small / ragged M: two padded tiles so both v7x cores get work.
    tm = min(_round_up((M + 1) // 2, 8), cap)
    return tm, _round_up(M, tm)


def _plan_tiles(M, dim, hidden, cbytes, out_bytes, budget):
    """Choose (tm, th, M_pad, streaming) within a VMEM byte budget."""
    th_candidates = [hidden]                      # resident weights first
    for t in (8192, 4096, 2048, 1024, 512, 256):  # 256-multiples (v6e/v7x MXU)
        if t < hidden and hidden % t == 0:
            th_candidates.append(t)
    if len(th_candidates) == 1 and 128 < hidden and hidden % 128 == 0:
        th_candidates.append(128)                 # only if no 256-multiple fits

    for th in th_candidates:
        streaming = th < hidden
        w_tiles = 2 * 2 * dim * th * cbytes       # w1+w2 tiles, double-buffered
        bias = 2 * 2 * (th + dim) * cbytes
        per_row = (2 * dim * cbytes               # x tile, double-buffered
                   + 2 * dim * out_bytes          # out tile, double-buffered
                   + (dim * 4 if streaming else 0)  # fp32 accumulator scratch
                   + th * (4 + cbytes))           # fp32 h/g + cast for 2nd dot
        avail = budget - w_tiles - bias
        if avail <= 8 * per_row:
            continue
        tm_cap = min(avail // per_row, 2048 if streaming else 1024)
        tm, m_pad = _pick_tm(M, tm_cap)
        return tm, th, m_pad, streaming

    # Pathological fallback (e.g. hidden with no usable divisor): smallest tm.
    tm, m_pad = _pick_tm(M, 8)
    return tm, hidden, m_pad, False


# ----------------------------- wrapper --------------------------------------


@functools.partial(jax.jit,
                   static_argnames=("approximate_gelu", "vmem_budget_bytes"))
def feed_forward_pallas(x, w1, b1, w2, b2, *, approximate_gelu=False,
                        vmem_budget_bytes=None):
    """x: [B, S, dim]; w1: [dim, hidden]; b1: [1, hidden]; w2: [hidden, dim];
    b2: [1, dim].  Returns [B, S, dim] in x.dtype.  Compute runs in x.dtype
    (pass bf16 inputs for the bf16 MXU path) with fp32 accumulation."""
    B, S, dim = x.shape
    hidden = w1.shape[1]
    M = B * S

    cdtype = x.dtype
    out_dtype = x.dtype
    cbytes = jnp.dtype(cdtype).itemsize
    out_bytes = jnp.dtype(out_dtype).itemsize

    vmem_cap = _vmem_capacity_bytes()
    budget = (int(vmem_budget_bytes) if vmem_budget_bytes is not None
              else int(vmem_cap * 0.6))

    tm, th, M_pad, streaming = _plan_tiles(M, dim, hidden, cbytes, out_bytes,
                                           budget)

    x2d = x.reshape(M, dim)
    if M_pad != M:
        x2d = jnp.pad(x2d, ((0, M_pad - M), (0, 0)))
    w1c = w1.astype(cdtype)
    w2c = w2.astype(cdtype)
    b1r = b1.reshape(1, hidden)
    b2r = b2.reshape(1, dim)

    n_rows = M_pad // tm
    nk = (hidden // th) if streaming else 1

    footprint = (2 * 2 * dim * th * cbytes + 2 * 2 * (th + dim) * cbytes
                 + tm * (2 * dim * cbytes + 2 * dim * out_bytes
                         + (dim * 4 if streaming else 0) + th * (4 + cbytes)))
    vmem_limit = int(min(max(int(footprint * 1.4), 32 << 20),
                         int(vmem_cap * 0.9)))

    weight_passes = n_rows if streaming else 1
    cost = pl.CostEstimate(
        flops=4 * M_pad * dim * hidden,
        transcendentals=M_pad * hidden,
        bytes_accessed=(M_pad * dim * (cbytes + out_bytes)
                        + weight_passes * 2 * dim * hidden * cbytes
                        + (hidden + dim) * cbytes),
    )

    if not streaming:
        grid_spec = pltpu.PrefetchScalarGridSpec(
            num_scalar_prefetch=0,
            grid=(n_rows,),
            in_specs=[
                pl.BlockSpec((tm, dim), lambda i: (i, 0)),       # x tile
                pl.BlockSpec((dim, hidden), lambda i: (0, 0)),   # w1 (resident)
                pl.BlockSpec((1, hidden), lambda i: (0, 0)),     # b1 (resident)
                pl.BlockSpec((hidden, dim), lambda i: (0, 0)),   # w2 (resident)
                pl.BlockSpec((1, dim), lambda i: (0, 0)),        # b2 (resident)
            ],
            out_specs=pl.BlockSpec((tm, dim), lambda i: (i, 0)),
            scratch_shapes=[],
        )
        kernel = functools.partial(ffn_kernel_resident,
                                   approximate=approximate_gelu)
        dim_sem = ("parallel",)
    else:
        grid_spec = pltpu.PrefetchScalarGridSpec(
            num_scalar_prefetch=0,
            grid=(n_rows, nk),
            in_specs=[
                pl.BlockSpec((tm, dim), lambda i, k: (i, 0)),    # x tile
                pl.BlockSpec((dim, th), lambda i, k: (0, k)),    # w1 tile
                pl.BlockSpec((1, th), lambda i, k: (0, k)),      # b1 tile
                pl.BlockSpec((th, dim), lambda i, k: (k, 0)),    # w2 tile
                pl.BlockSpec((1, dim), lambda i, k: (0, 0)),     # b2 (resident)
            ],
            out_specs=pl.BlockSpec((tm, dim), lambda i, k: (i, 0)),
            scratch_shapes=[pltpu.VMEM((tm, dim), jnp.float32)],
        )
        kernel = functools.partial(ffn_kernel_streaming,
                                   approximate=approximate_gelu)
        dim_sem = ("parallel", "arbitrary")

    out2d = pl.pallas_call(
        kernel,
        out_shape=jax.ShapeDtypeStruct((M_pad, dim), out_dtype),
        grid_spec=grid_spec,
        compiler_params=pltpu.CompilerParams(
            dimension_semantics=dim_sem,
            vmem_limit_bytes=vmem_limit,
        ),
        cost_estimate=cost,
    )(x2d, w1c, b1r, w2c, b2r)

    if M_pad != M:
        out2d = out2d[:M]
    return out2d.reshape(B, S, dim)


# ----------------------------- reference / test -----------------------------


def reference_ffn(x, w1, b1, w2, b2):
    h = jnp.dot(x, w1) + b1[0]
    g = 0.5 * h * (1.0 + jax.lax.erf(h / jnp.sqrt(2.0)))
    return jnp.dot(g, w2) + b2[0]


if __name__ == "__main__":
    # --- Test 1: small shapes consistent with the module (exact fp32 path) ---
    B, S, dim, hidden = 2, 8, 32, 64
    key = jax.random.PRNGKey(0)
    kx, k1, k2, k3, k4 = jax.random.split(key, 5)
    x = jax.random.normal(kx, (B, S, dim), dtype=jnp.float32)
    lim1 = 1.0 / jnp.sqrt(jnp.float32(dim))
    lim2 = 1.0 / jnp.sqrt(jnp.float32(hidden))
    w1 = jax.random.uniform(k1, (dim, hidden), jnp.float32, -lim1, lim1)
    b1 = jax.random.uniform(k2, (1, hidden), jnp.float32, -lim1, lim1)
    w2 = jax.random.uniform(k3, (hidden, dim), jnp.float32, -lim2, lim2)
    b2 = jax.random.uniform(k4, (1, dim), jnp.float32, -lim2, lim2)

    out = jax.block_until_ready(feed_forward_pallas(x, w1, b1, w2, b2))
    ref = reference_ffn(x, w1, b1, w2, b2)
    assert out.shape == (B, S, dim)
    assert jnp.allclose(out, ref, atol=1e-5, rtol=1e-5), "fp32 small mismatch"

    # --- Test 2: resident-weight fast path, multiple row tiles (fp32) ---
    B2, S2, dim2, hidden2 = 4, 384, 256, 1024
    kx2, k5, k6, k7, k8 = jax.random.split(jax.random.PRNGKey(1), 5)
    x2 = jax.random.normal(kx2, (B2, S2, dim2), dtype=jnp.float32)
    w1b = jax.random.normal(k5, (dim2, hidden2), jnp.float32) * 0.02
    b1b = jax.random.normal(k6, (1, hidden2), jnp.float32) * 0.02
    w2b = jax.random.normal(k7, (hidden2, dim2), jnp.float32) * 0.02
    b2b = jax.random.normal(k8, (1, dim2), jnp.float32) * 0.02
    out2 = jax.block_until_ready(feed_forward_pallas(x2, w1b, b1b, w2b, b2b))
    ref2 = reference_ffn(x2, w1b, b1b, w2b, b2b)
    assert jnp.allclose(out2, ref2, atol=1e-4, rtol=1e-4), "resident mismatch"

    # --- Test 3: bf16 compute path (bf16 MXU) + tanh-approx GELU ---
    out3 = jax.block_until_ready(
        feed_forward_pallas(x2.astype(jnp.bfloat16), w1b.astype(jnp.bfloat16),
                            b1b, w2b.astype(jnp.bfloat16), b2b,
                            approximate_gelu=True))
    assert jnp.allclose(out3.astype(jnp.float32), ref2, atol=3e-2, rtol=5e-2), \
        "bf16 mismatch"

    # --- Test 4: force the streaming (hidden-tiled, fp32-accumulator) path ---
    out4 = jax.block_until_ready(
        feed_forward_pallas(x2, w1b, b1b, w2b, b2b,
                            vmem_budget_bytes=3 << 20))
    assert jnp.allclose(out4, ref2, atol=1e-4, rtol=1e-4), "streaming mismatch"

    print("KERNEL_OK")
</pallas_src>

<mosaic_0001>
module attributes {stable_mosaic.version = 11 : i64} {
  func.func @ffn_kernel_resident(%arg0: i32, %arg1: memref<8x32xf32, #tpu.memory_space<vmem>>, %arg2: memref<32x64xf32, #tpu.memory_space<vmem>>, %arg3: memref<1x64xf32, #tpu.memory_space<vmem>>, %arg4: memref<64x32xf32, #tpu.memory_space<vmem>>, %arg5: memref<1x32xf32, #tpu.memory_space<vmem>>, %arg6: memref<8x32xf32, #tpu.memory_space<vmem>>) attributes {dimension_semantics = [#tpu.dimension_semantics<parallel>], iteration_bounds = array<i64: 2>, scalar_prefetch = 0 : i64, scratch_operands = 0 : i64, tpu.core_type = #tpu.core_type<tc>, window_params = [{transform_indices = @transform_0, window_bounds = array<i64: 8, 32>}, {pipeline_mode = #tpu.pipeline_mode<synchronous>, transform_indices = @transform_1, window_bounds = array<i64: 32, 64>}, {pipeline_mode = #tpu.pipeline_mode<synchronous>, transform_indices = @transform_2, window_bounds = array<i64: 1, 64>}, {pipeline_mode = #tpu.pipeline_mode<synchronous>, transform_indices = @transform_3, window_bounds = array<i64: 64, 32>}, {pipeline_mode = #tpu.pipeline_mode<synchronous>, transform_indices = @transform_4, window_bounds = array<i64: 1, 32>}, {transform_indices = @transform_5, window_bounds = array<i64: 8, 32>}]} {
    %c0 = arith.constant 0 : index
    %c0_0 = arith.constant 0 : index
    %0 = vector.load %arg1[%c0, %c0_0] : memref<8x32xf32, #tpu.memory_space<vmem>>, vector<8x32xf32>
    %c0_1 = arith.constant 0 : index
    %c0_2 = arith.constant 0 : index
    %1 = vector.load %arg2[%c0_1, %c0_2] : memref<32x64xf32, #tpu.memory_space<vmem>>, vector<32x64xf32>
    %cst = arith.constant dense<0.000000e+00> : vector<8x64xf32>
    %2 = tpu.matmul %0, %1, %cst {dimension_numbers = #tpu.dot_dimension_numbers<[1], [0], [0], [1], [0, 0, 1, 1], [], []>} : vector<8x32xf32>, vector<32x64xf32>, vector<8x64xf32> -> vector<8x64xf32>
    %c0_3 = arith.constant 0 : index
    %c0_4 = arith.constant 0 : index
    %3 = vector.load %arg3[%c0_3, %c0_4] : memref<1x64xf32, #tpu.memory_space<vmem>>, vector<1x64xf32>
    %4 = vector.broadcast %3 : vector<1x64xf32> to vector<8x64xf32>
    %5 = arith.addf %2, %4 : vector<8x64xf32>
    %cst_5 = arith.constant 5.000000e-01 : f32
    %6 = vector.broadcast %cst_5 : f32 to vector<8x64xf32>
    %7 = arith.mulf %6, %5 : vector<8x64xf32>
    %cst_6 = arith.constant 0.707106769 : f32
    %8 = vector.broadcast %cst_6 : f32 to vector<8x64xf32>
    %9 = arith.mulf %5, %8 : vector<8x64xf32>
    %10 = math.erf %9 : vector<8x64xf32>
    %cst_7 = arith.constant 1.000000e+00 : f32
    %11 = vector.broadcast %cst_7 : f32 to vector<8x64xf32>
    %12 = arith.addf %11, %10 : vector<8x64xf32>
    %13 = arith.mulf %7, %12 : vector<8x64xf32>
    %c0_8 = arith.constant 0 : index
    %c0_9 = arith.constant 0 : index
    %14 = vector.load %arg4[%c0_8, %c0_9] : memref<64x32xf32, #tpu.memory_space<vmem>>, vector<64x32xf32>
    %cst_10 = arith.constant dense<0.000000e+00> : vector<8x32xf32>
    %15 = tpu.matmul %13, %14, %cst_10 {dimension_numbers = #tpu.dot_dimension_numbers<[1], [0], [0], [1], [0, 0, 1, 1], [], []>} : vector<8x64xf32>, vector<64x32xf32>, vector<8x32xf32> -> vector<8x32xf32>
    %c0_11 = arith.constant 0 : index
    %c0_12 = arith.constant 0 : index
    %16 = vector.load %arg5[%c0_11, %c0_12] : memref<1x32xf32, #tpu.memory_space<vmem>>, vector<1x32xf32>
    %17 = vector.broadcast %16 : vector<1x32xf32> to vector<8x32xf32>
    %18 = arith.addf %15, %17 : vector<8x32xf32>
    %c0_13 = arith.constant 0 : index
    %c0_14 = arith.constant 0 : index
    %19 = vector.load %arg6[%c0_13, %c0_14] : memref<8x32xf32, #tpu.memory_space<vmem>>, vector<8x32xf32>
    tpu.vector_store %arg6[%c0_13, %c0_14], %18 {strides = array<i32>} : memref<8x32xf32, #tpu.memory_space<vmem>>, vector<8x32xf32>,
    return
  }
  func.func @transform_0(%arg0: i32) -> (i32, i32) {
    %c0_i32 = arith.constant 0 : i32
    %c0_i32_0 = arith.constant 0 : i32
    return %arg0, %c0_i32 : i32, i32
  }
  func.func @transform_1(%arg0: i32) -> (i32, i32) {
    %c0_i32 = arith.constant 0 : i32
    %c0_i32_0 = arith.constant 0 : i32
    %c0_i32_1 = arith.constant 0 : i32
    return %c0_i32, %c0_i32_0 : i32, i32
  }
  func.func @transform_2(%arg0: i32) -> (i32, i32) {
    %c0_i32 = arith.constant 0 : i32
    %c0_i32_0 = arith.constant 0 : i32
    %c0_i32_1 = arith.constant 0 : i32
    return %c0_i32, %c0_i32_0 : i32, i32
  }
  func.func @transform_3(%arg0: i32) -> (i32, i32) {
    %c0_i32 = arith.constant 0 : i32
    %c0_i32_0 = arith.constant 0 : i32
    %c0_i32_1 = arith.constant 0 : i32
    return %c0_i32, %c0_i32_0 : i32, i32
  }
  func.func @transform_4(%arg0: i32) -> (i32, i32) {
    %c0_i32 = arith.constant 0 : i32
    %c0_i32_0 = arith.constant 0 : i32
    %c0_i32_1 = arith.constant 0 : i32
    return %c0_i32, %c0_i32_0 : i32, i32
  }
  func.func @transform_5(%arg0: i32) -> (i32, i32) {
    %c0_i32 = arith.constant 0 : i32
    %c0_i32_0 = arith.constant 0 : i32
    return %arg0, %c0_i32 : i32, i32
  }
}

</mosaic_0001>

<bundles_post_ra>
// kernel: feed_forward_pallas.1
= control target key start
LH: loop header
LB: loop body
LE: loop exit
PB: predicated region body
PF: predicated region fallthrough
CT: control target
= control target key end

     0   :  { %10 = vsyncpa [#allocation3], 0  ;;  %s836_s0 = inlined_call_operand.vmem [shape: f32[16,32], index: 0, kind: input, shape index: {}]   ;;  %s837_s1 = inlined_call_operand.vmem [shape: f32[32,64], index: 1, kind: input, shape index: {}]   ;;  %s838_s2 = inlined_call_operand.vmem [shape: f32[1,64], index: 2, kind: input, shape index: {}]   ;;  %s839_s3 = inlined_call_operand.vmem [shape: f32[64,32], index: 3, kind: input, shape index: {}]   ;;  %s840_s4 = inlined_call_operand.vmem [shape: f32[1,32], index: 4, kind: input, shape index: {}]   ;;  %s841_s5 = inlined_call_operand.hbm [shape: f32[16,32], index: 5, kind: output, shape index: {}]  }
   0x1   :  { %12 = vsyncpa [#allocation3 + $0x1], 0  ;;  %s692_s18 = smov 0   ;;  %s694_s19 = smov 0  }
   0x2   :  { %s696_s20 = smov 0   ;;  %s698_s21 = smov 0  }
   0x3 LB: > { %s713_s22 = sadd.s32 4294967295, %s656_s21   ;;  %s474_s23 = sadd.s32 4294967294, %s656_s21   ;;  %s656_s21 = sphi %s698_s21, %s847_s21   ;;  %s652_s20 = sphi %s696_s20, %s846_s20   ;;  %s648_s19 = sphi %s694_s19, %s845_s19   ;;  %s644_s18 = sphi %s692_s18, %s844_s18  }
   0x4   : > { %s717_s24 = sadd.s32 1, %s656_s21   ;;  %s135_s25 = sadd.s32 1, %s652_s20 }
   0x5   : > { %s132_s26 = ssub.s32 %s656_s21, %s717_s24  ;;  %p145_p0 = scmp.ne.s32.totalorder %s652_s20, %s648_s19 }
   0x6   : > { %p133_p1 = scmp.eq.s32.totalorder %s132_s26, 0  ;;  %p146_p2 = scmp.eq.s32.totalorder %s713_s22, 1 }
   0x7   : > { %p151_p3 = scmp.ne.s32.totalorder %s648_s19, %s644_s18  ;;  %p152_p4 = scmp.eq.s32.totalorder %s474_s23, 1 }
   0x8   : > { %s728_s27 = scalar_select %p133_p1, %s652_s20, %s135_s25  }
   0x9   : > { %p730_p5 = por %p146_p2, %p145_p0  ;;  %p734_p6 = por %p152_p4, %p151_p3 }
   0xa   : > { %p477_p7 = scmp.ge.s32.totalorder %s656_s21, 1  ;;  %p189_p8 = scmp.lt.s32.totalorder %s656_s21, 3 }
   0xc   : > { %p190_p9 = pnand %p477_p7, %p189_p8 }
   0xd   : > { %v221_v0 = vld [vmem:[%s837_s1] sm:$0xff] (!%p190_p9)  ;;  %v222_v1 = vld [vmem:[%s837_s1 + $0x8] sm:$0xff] (!%p190_p9)  ;;  %v223_v2 = vld [vmem:[%s837_s1 + $0x10] sm:$0xff] (!%p190_p9)  ;;  %v658_v3 = vmov (!%p190_p9), 0.0|0.0   ;;  %vm659_vm0 = vmmov (!%p190_p9), 0   ;;  %v660_v6 = vmov (!%p190_p9), 0.0  }
   0xe   : > { %193 = sbr.rel (%p190_p9) target bundleno = 485 (0x1e5), region = 40  ;;  %532 = vmatprep.subr.bf16.mxu0 (!%p190_p9), %v658_v3  ;;  %v533_v4 = vpack.c.bf16 (!%p190_p9), %v222_v1, %v221_v0  ;;  %v224_v5 = vld [vmem:[%s837_s1 + $0x18] sm:$0xff] (!%p190_p9)  ;;  %510 = vmatprep.mubr.msk.f32.mxu0 (!%p190_p9), %vm659_vm0, %v660_v6  ;;  %p216_p10 = scmp.lt.s32.totalorder (!%p190_p9), %s713_s22, 1  ;;  %vm232_vm1 = vcmask (!%p190_p9), 261120   ;;  %v311_v9 = vld [vmem:[%s839_s3] sm:$0xff] (!%p190_p9)  ;;  %v312_v10 = vld [vmem:[%s839_s3 + $0x8] sm:$0xff] (!%p190_p9) }
   0xf   : > { %538 = vmatprep.subr.bf16.mxu1 (!%p190_p9), %v658_v3  ;;  %529 = vmatprep.mubr.msk.f32.mxu1 (!%p190_p9), %vm659_vm0, %v660_v6  ;;  %v536_v7 = vpack.c.bf16 (!%p190_p9), %v224_v5, %v223_v2  ;;  %v539_v11 = vpack.c.bf16 (!%p190_p9), %v312_v10, %v311_v9  ;;  %v313_v12 = vld [vmem:[%s839_s3 + $0x10] sm:$0xff] (!%p190_p9)  ;;  %v314_v13 = vld [vmem:[%s839_s3 + $0x18] sm:$0xff] (!%p190_p9)  ;;  %v315_v15 = vld [vmem:[%s839_s3 + $0x20] sm:$0xff] (!%p190_p9)  ;;  %vm326_vm2 = vcmask (!%p190_p9), 523264   ;;  %s213_s26 = sand.u32 (!%p190_p9), 1, %s648_s19   ;;  %s485_s8 = sshll.u32 (!%p190_p9), %s713_s22, 7 }
  0x10   : > { %534 = vmatpush3.bf16.msra.mxu0 (!%p190_p9), %v533_v4  ;;  %v542_v14 = vpack.c.bf16 (!%p190_p9), %v314_v13, %v313_v12  ;;  %v316_v16 = vld [vmem:[%s839_s3 + $0x28] sm:$0xff] (!%p190_p9)  ;;  %v317_v18 = vld [vmem:[%s839_s3 + $0x30] sm:$0xff] (!%p190_p9)  ;;  %v318_v19 = vld [vmem:[%s839_s3 + $0x38] sm:$0xff] (!%p190_p9)  ;;  %s478_s30 = sshll.u32 (!%p190_p9), %s213_s26, 3 }
  0x11   : > { %535 = vmatprep.subr.bf16.mxu0 (!%p190_p9), %v658_v3  ;;  %540 = vmatpush3.bf16.msra.mxu1 (!%p190_p9), %v539_v11  ;;  %v545_v17 = vpack.c.bf16 (!%p190_p9), %v316_v16, %v315_v15  ;;  %v548_v20 = vpack.c.bf16 (!%p190_p9), %v318_v19, %v317_v18  ;;  %v480_v21 = vld [vmem:[%s838_s2] ss:$0 sm:$0xff] (!%p190_p9)  ;;  %s215_s9 = scalar_lea.vmem (!%p190_p9), [#allocation2], %s478_s30 }
  0x12   : > { %541 = vmatprep.subr.bf16.mxu1 (!%p190_p9), %v658_v3  ;;  %v482_v30 = vld [vmem:[%s840_s4] ss:$0 sm:$0xff] (!%p190_p9)  ;;  %s415_s10 = sshll.u32 (!%p190_p9), %s215_s9, 4  ;;  %s795_s10 = int_to_ptr.vmem [resolvable:$true] %s415_s10 }
  0x13   : > { %s594_s15 = scalar_lea.vmem (!%p190_p9), %s795_s10, 128 }
  0x14   : > { %537 = vmatpush3.bf16.msra.mxu0 (!%p190_p9), %v536_v7  ;;  %p595_p11 = scmp.ne.s32.totalorder (!%p190_p9), %s795_s10, %s594_s15 }
  0x15   : > { %s217_s13 = scalar_select %p216_p10, %s713_s22, 1  ;;  %543 = vmatpush3.bf16.msra.mxu1 %v542_v14 }
  0x16   : > { %544 = vmatprep.subr.bf16.mxu1 %v658_v3  ;;  %p596_p12 = pnand %p595_p11, %p730_p5  ;;  %s661_s22 = smov [#allocation2]  }
  0x17   : > { %s479_s14 = sshll.u32 %s217_s13, 3  ;;  %s793_s13 = scalar_lea.hbm %s841_s5, %s485_s8 }
  0x18   : > { %s219_s17 = scalar_lea.vmem %s836_s0, %s479_s14  ;;  %s402_s14 = scalar_lea.sflag [#allocation3], %s213_s26 }
  0x19   : > { %v220_v8 = vld [vmem:[%s219_s17] sm:$0xff]  ;;  %546 = vmatpush3.bf16.msra.mxu1 %v545_v17  ;;  %p597_p13 = pneg %p596_p12  ;;  %s598_s16 = sshll.u32 %s661_s22, 4  ;;  %s599_s16 = int_to_ptr.vmem [resolvable:$false] %s598_s16 }
  0x1a   : > { %511 = vmatmul.mubr.msk.f32.vlgmr.msra.gmra.mrb[0].mxu0 %vm232_vm1, %v220_v8  ;;  %547 = vmatprep.subr.bf16.mxu1 %v658_v3  ;;  %s600_s17 = scalar_lea.vmem %s599_s16, 256  ;;  %p601_p0 = scmp.lt.s32.totalorder %s795_s10, %s599_s16 }
  0x1b   : > { %p602_p1 = scmp.lt.s32.totalorder %s600_s17, %s594_s15 }
  0x1d   : > { %549 = vmatpush3.bf16.msra.mxu1 %v548_v20  ;;  %p603_p2 = por %p602_p1, %p601_p0 }
  0x1f   : > { %p604_p3 = pnand %p603_p2, %p597_p13 }
  0xed   : > { %v302_v22 = vpop.f32.mrb[0].mxu0 }
  0xee   : > { %v303_v23 = vadd.f32 %v480_v21, %v302_v22  ;;  %v512_v24 = vpop.f32.mrb[1].mxu0 }
  0xf0   : > { %v307_v25 = vmul.f32 0.70710677, %v303_v23  ;;  %v306_v27 = vmul.f32 0.5, %v303_v23 }
  0xf2   : > { %592 = verf.f32 %v307_v25 }
  0xfc   : > { %v593_v26 = vpop.eup %592 }
  0xfd   : > { %v309_v28 = vadd.f32 1.0, %v593_v26 }
  0xff   : > { %v310_v29 = vmul.f32 %v309_v28, %v306_v27 }
 0x101   : > { %530 = vmatmul.mubr.msk.f32.vlgmr.msra.gmra.mrb[0].mxu1 %vm326_vm2, %v310_v29 }
 0x1d4   : > { %v396_v31 = vpop.f32.mrb[0].mxu1 }
 0x1d5   : > { %v397_v32 = vadd.f32 %v482_v30, %v396_v31  ;;  %v531_v33 = vpop.f32.mrb[1].mxu1 }
 0x1d7   : > { %400 = vst.msk [vmem:[%s215_s9] sm:$0xff] %vm232_vm1, %v397_v32 }
 0x1d8   : > { %607 = shalt.err (!%p604_p3)
}
 0x1d9   : > { %s608_s23 = scalar_lea.hbm %s793_s13, 128  ;;  %s612_s30 = scalar_lea.hbm %s841_s5, 256 }
 0x1da   : > { %p609_p4 = scmp.ne.s32.totalorder %s793_s13, %s608_s23  ;;  %p613_p9 = scmp.lt.u32.totalorder %s793_s13, %s841_s5 }
 0x1db   : > { %p614_p10 = scmp.lt.u32.totalorder %s612_s30, %s608_s23  ;;  %p616_p12 = scmp.lt.u32.totalorder %s608_s23, %s793_s13 }
 0x1dc   : > { %p610_p7 = pnand %p609_p4, %p730_p5 }
 0x1dd   : > { %p615_p11 = por %p614_p10, %p613_p9 }
 0x1de   : > { %p611_p8 = pneg %p610_p7 }
 0x1df   : > { %p617_p13 = por %p616_p12, %p615_p11 }
 0x1e1   : > { %p618_p0 = pnand %p617_p13, %p611_p8 }
 0x1e3   : > { %621 = shalt.err (!%p618_p0)
}
 0x1e4   : > { %550 = dma.vmem_to_hbm [thread:$0]  (%p730_p5), %s795_s10, 128, %s793_s13, %s402_s14  }
 0x1e5 PF: > { %p556_p1 = scmp.ge.s32.totalorder %s656_s21, 2  ;;  %s427_s8 = sand.u32 1, %s644_s18  }
 0x1e6   : > { %s428_s9 = scalar_lea.sflag [#allocation3], %s427_s8 }
 0x1e7   : > { %p553_p2 = pnand %p556_p1, %p734_p6 }
 0x1e9   : > { %639 = dma.done.wait (!%p553_p2), %s428_s9, 128  }
 0x1ea   : > { %641 = vsyncadd (!%p553_p2), %s428_s9, 4294967168  ;;  %p15_p3 = scmp.ge.s32.totalorder %s717_s24, 4   ;;  %s844_s18 = smov %s648_s19 }
 0x1eb   : > { %s845_s19 = smov %s652_s20  ;;  %s846_s20 = smov %s728_s27 }
 0x1ec   : > { %s847_s21 = smov %s717_s24  ;;  %17 = sbr.rel (!%p15_p3) target bundleno = 3 (0x3), region = 75 }
 0x1f3   :  { %433 = vsyncpa [#allocation3], 1 }
 0x1f4   :  { %435 = vsyncpa [#allocation3 + $0x1], 1 }

</bundles_post_ra>
